<compile_context>
chip_gen: v5e
topology: v5e:2x2
jax: 0.10.0
libtpu: 0.0.40
codegen_flags: <defaults>
</compile_context>

<pallas_src>
import jax
import jax.numpy as jnp
from jax.experimental import pallas as pl
from jax.experimental.pallas import tpu as pltpu


def _policy_kernel(x_ref, wt_ref, out_ref):
    # x_ref:  (tb, S)  batch tile of one-hot states
    # wt_ref: (S, A)   pre-transposed weight, resident across the batch grid
    # out_ref:(tb, A)  action probabilities
    logits = jnp.dot(
        x_ref[...], wt_ref[...], preferred_element_type=jnp.float32
    )  # (tb, A) float32 MXU accumulation

    # Numerically-stable softmax over the action axis (PyTorch dim=1), in f32.
    m = jnp.max(logits, axis=-1, keepdims=True)
    e = jnp.exp(logits - m)
    denom = jnp.sum(e, axis=-1, keepdims=True)
    probs = e / denom  # exact divide: rows sum to 1 within f32 rounding
    out_ref[...] = probs.astype(out_ref.dtype)


def _vmem_capacity_bytes():
    """Generation-aware VMEM capacity; conservative fallback if unqueryable."""
    try:
        return int(pltpu.get_tpu_info().vmem_capacity_bytes)
    except Exception:
        return 64 * 1024 * 1024  # v7x-sized per-TC VMEM (most conservative)


def _pick_batch_tile(B, S, A, itemsize, budget_bytes):
    """Largest batch tile such that double-buffered x/out tiles, the (default
    double-buffered) resident weight, and f32 softmax intermediates fit the
    VMEM budget."""
    weight_bytes = 2 * A * S * 4                      # 2 buffers, count as f32
    per_row = 2 * (S + A) * itemsize + 6 * A * 4      # pipelined tiles + f32 temps
    tb = (budget_bytes - weight_bytes) // max(per_row, 1)
    sub = 16 if itemsize < 4 else 8                   # bf16 packs 2 rows / sublane
    tb = max(sub, min(tb, B))
    tb = max(sub, (tb // sub) * sub)
    if tb >= B and B * S * itemsize >= 4 * 1024 * 1024:
        # Big problem that still fits one tile: split into >=2 tiles so the
        # "parallel" batch axis can use both TensorCores on v7x.
        half = -(-B // 2)
        tb = max(sub, ((half + sub - 1) // sub) * sub)
    return int(tb)


def sigmoid_policy_forward(one_hot_state, weight, *, tb=None):
    """
    one_hot_state: (B, num_states)           -- dense input, same as the nn.Module
    weight:        (num_actions, num_states) -- PyTorch nn.Linear layout
    returns:       (B, num_actions) action probabilities (softmax over dim=1)
    """
    B, S = one_hot_state.shape
    A, S_w = weight.shape
    assert S == S_w, f"weight/input mismatch: {weight.shape} vs {one_hot_state.shape}"

    # One-time tiny transpose in the wrapper so the kernel's matmul needs no
    # per-grid-step weight relayout.
    w_t = weight.T  # (S, A)

    cap = _vmem_capacity_bytes()
    budget = int(cap * 0.6)
    itemsize = jnp.dtype(one_hot_state.dtype).itemsize
    if tb is None:
        tb = _pick_batch_tile(B, S, A, itemsize, budget)
    tb = int(min(tb, max(B, 8)))

    grid = (pl.cdiv(B, tb),)

    return pl.pallas_call(
        _policy_kernel,
        out_shape=jax.ShapeDtypeStruct((B, A), one_hot_state.dtype),
        grid_spec=pltpu.PrefetchScalarGridSpec(
            num_scalar_prefetch=0,
            grid=grid,
            in_specs=[
                # Batch-tiled activations: pipelined along the grid.
                pl.BlockSpec((tb, S), lambda i: (i, 0)),
                # Weight: single block, index_map constant -> VMEM-resident.
                pl.BlockSpec((S, A), lambda i: (0, 0)),
            ],
            out_specs=pl.BlockSpec((tb, A), lambda i: (i, 0)),
        ),
        compiler_params=pltpu.CompilerParams(
            # Batch tiles are independent -> shard across TCs on v7x.
            dimension_semantics=("parallel",),
            # Raise scoped VMEM consistent with the tile-picking budget.
            vmem_limit_bytes=int(cap * 3 // 4),
        ),
    )(one_hot_state, w_t)


if __name__ == "__main__":
    key = jax.random.PRNGKey(0)
    batch = 256
    num_states = 64
    num_actions = 16

    k_w, k_x = jax.random.split(key)

    # nn.Linear default-ish init (uniform in +/- 1/sqrt(fan_in)), PyTorch layout (A, S).
    bound = 1.0 / jnp.sqrt(jnp.float32(num_states))
    weight = jax.random.uniform(
        k_w, (num_actions, num_states), minval=-bound, maxval=bound,
        dtype=jnp.float32,
    )

    # Deterministic one-hot state batch.
    state_idx = jax.random.randint(k_x, (batch,), 0, num_states)
    one_hot_state = jax.nn.one_hot(state_idx, num_states, dtype=jnp.float32)

    # Default tb: the whole (small) batch fits one tile -> grid=(1,), which is
    # the right call at this size (a second grid step would just add overhead).
    probs = sigmoid_policy_forward(one_hot_state, weight)
    jax.block_until_ready(probs)

    # Reference in plain JAX.
    ref = jax.nn.softmax(one_hot_state @ weight.T, axis=1)
    assert probs.shape == (batch, num_actions)
    assert jnp.allclose(probs, ref, atol=1e-5, rtol=1e-5)
    assert jnp.allclose(jnp.sum(probs, axis=1), 1.0, atol=1e-5)

    print("KERNEL_OK")
</pallas_src>

<mosaic_0001>
module attributes {stable_mosaic.version = 11 : i64} {
  func.func @_policy_kernel(%arg0: i32, %arg1: memref<256x64xf32, #tpu.memory_space<vmem>>, %arg2: memref<64x16xf32, #tpu.memory_space<vmem>>, %arg3: memref<256x16xf32, #tpu.memory_space<vmem>>) attributes {dimension_semantics = [#tpu.dimension_semantics<parallel>], iteration_bounds = array<i64: 1>, scalar_prefetch = 0 : i64, scratch_operands = 0 : i64, tpu.core_type = #tpu.core_type<tc>, window_params = [{transform_indices = @transform_0, window_bounds = array<i64: 256, 64>}, {pipeline_mode = #tpu.pipeline_mode<synchronous>, transform_indices = @transform_1, window_bounds = array<i64: 64, 16>}, {transform_indices = @transform_2, window_bounds = array<i64: 256, 16>}]} {
    %c0 = arith.constant 0 : index
    %c0_0 = arith.constant 0 : index
    %0 = vector.load %arg1[%c0, %c0_0] : memref<256x64xf32, #tpu.memory_space<vmem>>, vector<256x64xf32>
    %c0_1 = arith.constant 0 : index
    %c0_2 = arith.constant 0 : index
    %1 = vector.load %arg2[%c0_1, %c0_2] : memref<64x16xf32, #tpu.memory_space<vmem>>, vector<64x16xf32>
    %cst = arith.constant dense<0.000000e+00> : vector<256x16xf32>
    %2 = tpu.matmul %0, %1, %cst {dimension_numbers = #tpu.dot_dimension_numbers<[1], [0], [0], [1], [0, 0, 1, 1], [], []>} : vector<256x64xf32>, vector<64x16xf32>, vector<256x16xf32> -> vector<256x16xf32>
    %cst_3 = arith.constant dense<0xFF800000> : vector<256xf32>
    %3 = vector.multi_reduction <maximumf>, %2, %cst_3 [1] : vector<256x16xf32> to vector<256xf32>
    %4 = vector.shape_cast %3 : vector<256xf32> to vector<256x1xf32>
    %5 = vector.broadcast %4 : vector<256x1xf32> to vector<256x16xf32>
    %6 = arith.subf %2, %5 : vector<256x16xf32>
    %7 = math.exp %6 : vector<256x16xf32>
    %cst_4 = arith.constant dense<0.000000e+00> : vector<256xf32>
    %8 = vector.multi_reduction <add>, %7, %cst_4 [1] : vector<256x16xf32> to vector<256xf32>
    %9 = vector.shape_cast %8 : vector<256xf32> to vector<256x1xf32>
    %10 = vector.broadcast %9 : vector<256x1xf32> to vector<256x16xf32>
    %11 = arith.divf %7, %10 : vector<256x16xf32>
    %c0_5 = arith.constant 0 : index
    %c0_6 = arith.constant 0 : index
    %12 = vector.load %arg3[%c0_5, %c0_6] : memref<256x16xf32, #tpu.memory_space<vmem>>, vector<256x16xf32>
    tpu.vector_store %arg3[%c0_5, %c0_6], %11 {strides = array<i32>} : memref<256x16xf32, #tpu.memory_space<vmem>>, vector<256x16xf32>,
    return
  }
  func.func @transform_0(%arg0: i32) -> (i32, i32) {
    %c0_i32 = arith.constant 0 : i32
    %c0_i32_0 = arith.constant 0 : i32
    return %arg0, %c0_i32 : i32, i32
  }
  func.func @transform_1(%arg0: i32) -> (i32, i32) {
    %c0_i32 = arith.constant 0 : i32
    %c0_i32_0 = arith.constant 0 : i32
    %c0_i32_1 = arith.constant 0 : i32
    return %c0_i32, %c0_i32_0 : i32, i32
  }
  func.func @transform_2(%arg0: i32) -> (i32, i32) {
    %c0_i32 = arith.constant 0 : i32
    %c0_i32_0 = arith.constant 0 : i32
    return %arg0, %c0_i32 : i32, i32
  }
}

</mosaic_0001>

<bundles_post_ra>
// kernel: tpu_custom_call.1
= control target key start
LH: loop header
LB: loop body
LE: loop exit
PB: predicated region body
PF: predicated region fallthrough
CT: control target
= control target key end

     0   :  { %vm51_vm0 = vcmask 523264   ;;  %vm261_vm1 = vcmask 130048   ;;  %s2206_s1 = inlined_call_operand.vmem [shape: f32[64,16], index: 1, kind: input, shape index: {}]   ;;  %s2207_s0 = inlined_call_operand.vmem [shape: f32[256,64], index: 0, kind: input, shape index: {}]   ;;  %s2208_s2 = inlined_call_operand.vmem [shape: f32[256,16], index: 2, kind: output, shape index: {}]  }
   0x1   :  { %v50_v0 = vld [vmem:[%s2206_s1 + $0x38] sm:$0xff]  ;;  %v49_v1 = vld [vmem:[%s2206_s1 + $0x30] sm:$0xff]  ;;  %v48_v2 = vld [vmem:[%s2206_s1 + $0x28] sm:$0xff] }
   0x2   :  { %156 = vmatpush.msra.mxu0 %v50_v0  ;;  %1098 = vmatpush.msra.mxu1 %v50_v0  ;;  %v47_v3 = vld [vmem:[%s2206_s1 + $0x20] sm:$0xff]  ;;  %v46_v4 = vld [vmem:[%s2206_s1 + $0x18] sm:$0xff]  ;;  %v45_v5 = vld [vmem:[%s2206_s1 + $0x10] sm:$0xff] }
   0x3   :  { %1099 = vmatpush.msra.mxu2 %v50_v0  ;;  %1100 = vmatpush.msra.mxu3 %v50_v0  ;;  %v44_v6 = vld [vmem:[%s2206_s1 + $0x8] sm:$0xff]  ;;  %v43_v7 = vld [vmem:[%s2206_s1] sm:$0xff]  ;;  %v13_v16 = vld [vmem:[%s2207_s0 + $0x10] sm:$0xff] }
   0x4   :  { %157 = vmatpush.msra.mxu0 %v49_v1  ;;  %1101 = vmatpush.msra.mxu1 %v49_v1  ;;  %v11_v8 = vld [vmem:[%s2207_s0] sm:$0xff]  ;;  %v12_v12 = vld [vmem:[%s2207_s0 + $0x8] sm:$0xff]  ;;  %v21_v17 = vld [vmem:[%s2207_s0 + $0x50] sm:$0xff] }
   0x5   :  { %1102 = vmatpush.msra.mxu2 %v49_v1  ;;  %1103 = vmatpush.msra.mxu3 %v49_v1  ;;  %v19_v9 = vld [vmem:[%s2207_s0 + $0x40] sm:$0xff]  ;;  %v20_v13 = vld [vmem:[%s2207_s0 + $0x48] sm:$0xff]  ;;  %v37_v18 = vld [vmem:[%s2207_s0 + $0xd0] sm:$0xff] }
   0x6   :  { %158 = vmatpush.msra.mxu0 %v48_v2  ;;  %1104 = vmatpush.msra.mxu1 %v48_v2  ;;  %v27_v10 = vld [vmem:[%s2207_s0 + $0x80] sm:$0xff]  ;;  %v28_v14 = vld [vmem:[%s2207_s0 + $0x88] sm:$0xff]  ;;  %v29_v19 = vld [vmem:[%s2207_s0 + $0x90] sm:$0xff] }
   0x7   :  { %1105 = vmatpush.msra.mxu2 %v48_v2  ;;  %1106 = vmatpush.msra.mxu3 %v48_v2  ;;  %v35_v11 = vld [vmem:[%s2207_s0 + $0xc0] sm:$0xff]  ;;  %v36_v15 = vld [vmem:[%s2207_s0 + $0xc8] sm:$0xff]  ;;  %v14_v20 = vld [vmem:[%s2207_s0 + $0x18] sm:$0xff] }
   0x8   :  { %159 = vmatpush.msra.mxu0 %v47_v3  ;;  %1107 = vmatpush.msra.mxu1 %v47_v3  ;;  %v22_v21 = vld [vmem:[%s2207_s0 + $0x58] sm:$0xff]  ;;  %v15_v24 = vld [vmem:[%s2207_s0 + $0x20] sm:$0xff]  ;;  %v16_v28 = vld [vmem:[%s2207_s0 + $0x28] sm:$0xff] }
   0x9   :  { %1108 = vmatpush.msra.mxu2 %v47_v3  ;;  %1109 = vmatpush.msra.mxu3 %v47_v3  ;;  %v30_v22 = vld [vmem:[%s2207_s0 + $0x98] sm:$0xff]  ;;  %v23_v25 = vld [vmem:[%s2207_s0 + $0x60] sm:$0xff]  ;;  %v24_v29 = vld [vmem:[%s2207_s0 + $0x68] sm:$0xff] }
   0xa   :  { %160 = vmatpush.msra.mxu0 %v46_v4  ;;  %1110 = vmatpush.msra.mxu1 %v46_v4  ;;  %v38_v23 = vld [vmem:[%s2207_s0 + $0xd8] sm:$0xff]  ;;  %v31_v26 = vld [vmem:[%s2207_s0 + $0xa0] sm:$0xff]  ;;  %v32_v30 = vld [vmem:[%s2207_s0 + $0xa8] sm:$0xff] }
   0xb   :  { %1111 = vmatpush.msra.mxu2 %v46_v4  ;;  %1112 = vmatpush.msra.mxu3 %v46_v4  ;;  %v39_v27 = vld [vmem:[%s2207_s0 + $0xe0] sm:$0xff]  ;;  %v40_v31 = vld [vmem:[%s2207_s0 + $0xe8] sm:$0xff]  ;;  %v17_v32 = vld [vmem:[%s2207_s0 + $0x30] sm:$0xff] }
   0xc   :  { %161 = vmatpush.msra.mxu0 %v45_v5  ;;  %1113 = vmatpush.msra.mxu1 %v45_v5  ;;  %v25_v33 = vld [vmem:[%s2207_s0 + $0x70] sm:$0xff]  ;;  %v18_v36 = vld [vmem:[%s2207_s0 + $0x38] sm:$0xff] }
   0xd   :  { %1114 = vmatpush.msra.mxu2 %v45_v5  ;;  %1115 = vmatpush.msra.mxu3 %v45_v5  ;;  %v33_v34 = vld [vmem:[%s2207_s0 + $0xb0] sm:$0xff]  ;;  %v26_v37 = vld [vmem:[%s2207_s0 + $0x78] sm:$0xff] }
   0xe   :  { %162 = vmatpush.msra.mxu0 %v44_v6  ;;  %1116 = vmatpush.msra.mxu1 %v44_v6  ;;  %v41_v35 = vld [vmem:[%s2207_s0 + $0xf0] sm:$0xff]  ;;  %v34_v38 = vld [vmem:[%s2207_s0 + $0xb8] sm:$0xff] }
   0xf   :  { %1117 = vmatpush.msra.mxu2 %v44_v6  ;;  %1118 = vmatpush.msra.mxu3 %v44_v6  ;;  %v42_v39 = vld [vmem:[%s2207_s0 + $0xf8] sm:$0xff] }
  0x10   :  { %163 = vmatpush.msra.mxu0 %v43_v7  ;;  %1119 = vmatpush.msra.mxu1 %v43_v7 }
  0x11   :  { %1120 = vmatpush.msra.mxu2 %v43_v7  ;;  %1121 = vmatpush.msra.mxu3 %v43_v7 }
  0x12   :  { %1066 = vmatmul.msk.f32.vlgmr.msra.gmra.mxu0 %vm51_vm0, %v11_v8  ;;  %1074 = vmatmul.msk.f32.vlgmr.msra.gmra.mxu1 %vm51_vm0, %v19_v9 }
  0x13   :  { %1082 = vmatmul.msk.f32.vlgmr.msra.gmra.mxu2 %vm51_vm0, %v27_v10  ;;  %1090 = vmatmul.msk.f32.vlgmr.msra.gmra.mxu3 %vm51_vm0, %v35_v11 }
  0x1a   :  { %1067 = vmatmul.msk.f32.gmra.mxu0 %vm51_vm0, %v12_v12  ;;  %1075 = vmatmul.msk.f32.gmra.mxu1 %vm51_vm0, %v20_v13 }
  0x1b   :  { %1083 = vmatmul.msk.f32.gmra.mxu2 %vm51_vm0, %v28_v14  ;;  %1091 = vmatmul.msk.f32.gmra.mxu3 %vm51_vm0, %v36_v15 }
  0x22   :  { %1068 = vmatmul.msk.f32.gmra.mxu0 %vm51_vm0, %v13_v16  ;;  %1076 = vmatmul.msk.f32.gmra.mxu1 %vm51_vm0, %v21_v17 }
  0x23   :  { %1092 = vmatmul.msk.f32.gmra.mxu3 %vm51_vm0, %v37_v18  ;;  %1084 = vmatmul.msk.f32.gmra.mxu2 %vm51_vm0, %v29_v19 }
  0x2a   :  { %1069 = vmatmul.msk.f32.gmra.mxu0 %vm51_vm0, %v14_v20  ;;  %1077 = vmatmul.msk.f32.gmra.mxu1 %vm51_vm0, %v22_v21 }
  0x2b   :  { %1085 = vmatmul.msk.f32.gmra.mxu2 %vm51_vm0, %v30_v22  ;;  %1093 = vmatmul.msk.f32.gmra.mxu3 %vm51_vm0, %v38_v23 }
  0x32   :  { %1070 = vmatmul.msk.f32.gmra.mxu0 %vm51_vm0, %v15_v24  ;;  %1078 = vmatmul.msk.f32.gmra.mxu1 %vm51_vm0, %v23_v25 }
  0x33   :  { %1086 = vmatmul.msk.f32.gmra.mxu2 %vm51_vm0, %v31_v26  ;;  %1094 = vmatmul.msk.f32.gmra.mxu3 %vm51_vm0, %v39_v27 }
  0x3a   :  { %1071 = vmatmul.msk.f32.gmra.mxu0 %vm51_vm0, %v16_v28  ;;  %1079 = vmatmul.msk.f32.gmra.mxu1 %vm51_vm0, %v24_v29 }
  0x3b   :  { %1087 = vmatmul.msk.f32.gmra.mxu2 %vm51_vm0, %v32_v30  ;;  %1095 = vmatmul.msk.f32.gmra.mxu3 %vm51_vm0, %v40_v31 }
  0x42   :  { %1072 = vmatmul.msk.f32.gmra.mxu0 %vm51_vm0, %v17_v32  ;;  %1080 = vmatmul.msk.f32.gmra.mxu1 %vm51_vm0, %v25_v33 }
  0x43   :  { %1088 = vmatmul.msk.f32.gmra.mxu2 %vm51_vm0, %v33_v34  ;;  %1096 = vmatmul.msk.f32.gmra.mxu3 %vm51_vm0, %v41_v35 }
  0x4a   :  { %1073 = vmatmul.msk.f32.gmra.mxu0 %vm51_vm0, %v18_v36  ;;  %1081 = vmatmul.msk.f32.gmra.mxu1 %vm51_vm0, %v26_v37 }
  0x4b   :  { %1089 = vmatmul.msk.f32.gmra.mxu2 %vm51_vm0, %v34_v38  ;;  %1097 = vmatmul.msk.f32.gmra.mxu3 %vm51_vm0, %v42_v39 }
  0x8f   :  { %v1417_v40 = vpop.f32.mrf.mxu0  ;;  %v1419_v41 = vpop.f32.mrf.mxu1 }
  0x90   :  { %v286_v42 = vsel %vm261_vm1, %v1419_v41, -inf  ;;  %v262_v43 = vsel %vm261_vm1, %v1417_v40, -inf }
  0x91   :  { %287 = vmax.xlane.f32.xlu2 %v286_v42  ;;  %263 = vmax.xlane.f32.xlu0 %v262_v43 }
  0x96   :  { %v1425_v44 = vpop.f32.mrf.mxu2  ;;  %v1427_v45 = vpop.f32.mrf.mxu3 }
  0x97   :  { %v310_v46 = vsel %vm261_vm1, %v1425_v44, -inf  ;;  %v1431_v47 = vpop.f32.mrf.mxu0  ;;  %v1433_v48 = vpop.f32.mrf.mxu1  ;;  %v334_v49 = vsel %vm261_vm1, %v1427_v45, -inf }
  0x98   :  { %311 = vmax.xlane.f32.xlu1 %v310_v46  ;;  %v265_v55 = vsel %vm261_vm1, %v1431_v47, -inf  ;;  %v289_v61 = vsel %vm261_vm1, %v1433_v48, -inf }
  0x99   :  { %335 = vmax.xlane.f32.xlu0 %v334_v49 }
  0x9e   :  { %v1437_v50 = vpop.f32.mrf.mxu2  ;;  %v1439_v51 = vpop.f32.mrf.mxu3 }
  0x9f   :  { %v337_v52 = vsel %vm261_vm1, %v1439_v51, -inf  ;;  %v313_v53 = vsel %vm261_vm1, %v1437_v50, -inf  ;;  %v1445_v54 = vpop.f32.mrf.mxu0  ;;  %v1449_v56 = vpop.f32.mrf.mxu1 }
  0xa0   :  { %338 = vmax.xlane.f32.xlu1 %v337_v52  ;;  %314 = vmax.xlane.f32.xlu2 %v313_v53  ;;  %v268_v57 = vsel %vm261_vm1, %v1445_v54, -inf  ;;  %v292_v1 = vsel %vm261_vm1, %v1449_v56, -inf }
  0xa1   :  { %266 = vmax.xlane.f32.xlu0 %v265_v55 }
  0xa6   :  { %v1453_v58 = vpop.f32.mrf.mxu3  ;;  %v1455_v59 = vpop.f32.mrf.mxu2 }
  0xa7   :  { %v340_v60 = vsel %vm261_vm1, %v1453_v58, -inf  ;;  %v1461_v62 = vpop.f32.mrf.mxu0  ;;  %v1463_v63 = vpop.f32.mrf.mxu1  ;;  %v316_v2 = vsel %vm261_vm1, %v1455_v59, -inf }
  0xa8   :  { %341 = vmax.xlane.f32.xlu2 %v340_v60  ;;  %269 = vmax.xlane.f32.xlu1 %v268_v57  ;;  %v295_v0 = vsel %vm261_vm1, %v1463_v63, -inf  ;;  %v271_v6 = vsel %vm261_vm1, %v1461_v62, -inf }
  0xa9   :  { %290 = vmax.xlane.f32.xlu0 %v289_v61 }
  0xae   :  { %v1471_v3 = vpop.f32.mrf.mxu2  ;;  %v1475_v5 = vpop.f32.mrf.mxu3 }
  0xaf   :  { %v1473_v4 = vpop.f32.mrf.mxu0  ;;  %v343_v8 = vsel %vm261_vm1, %v1475_v5, -inf  ;;  %v1485_v10 = vpop.f32.mrf.mxu1  ;;  %v319_v11 = vsel %vm261_vm1, %v1471_v3, -inf }
  0xb0   :  { %296 = vmax.xlane.f32.xlu2 %v295_v0  ;;  %293 = vmax.xlane.f32.xlu1 %v292_v1  ;;  %v274_v7 = vsel %vm261_vm1, %v1473_v4, -inf  ;;  %v298_v13 = vsel %vm261_vm1, %v1485_v10, -inf }
  0xb1   :  { %317 = vmax.xlane.f32.xlu0 %v316_v2 }
  0xb6   :  { %v1483_v9 = vpop.f32.mrf.mxu2  ;;  %v1493_v14 = vpop.f32.mrf.mxu3 }
  0xb7   :  { %v322_v12 = vsel %vm261_vm1, %v1483_v9, -inf  ;;  %v1495_v15 = vpop.f32.mrf.mxu0  ;;  %v346_v17 = vsel %vm261_vm1, %v1493_v14, -inf  ;;  %v1505_v20 = vpop.f32.mrf.mxu1 }
  0xb8   :  { %272 = vmax.xlane.f32.xlu1 %v271_v6  ;;  %275 = vmax.xlane.f32.xlu2 %v274_v7  ;;  %v277_v18 = vsel %vm261_vm1, %v1495_v15, -inf  ;;  %v301_v23 = vsel %vm261_vm1, %v1505_v20, -inf }
  0xb9   :  { %344 = vmax.xlane.f32.xlu0 %v343_v8 }
  0xbe   :  { %v1497_v16 = vpop.f32.mrf.mxu2  ;;  %v1507_v21 = vpop.f32.mrf.mxu3 }
  0xbf   :  { %v325_v19 = vsel %vm261_vm1, %v1497_v16, -inf  ;;  %v1509_v22 = vpop.f32.mrf.mxu0  ;;  %v349_v24 = vsel %vm261_vm1, %v1507_v21, -inf  ;;  %v1519_v27 = vpop.f32.mrf.mxu1 }
  0xc0   :  { %320 = vmax.xlane.f32.xlu1 %v319_v11  ;;  %323 = vmax.xlane.f32.xlu2 %v322_v12  ;;  %v280_v25 = vsel %vm261_vm1, %v1509_v22, -inf  ;;  %v304_v30 = vsel %vm261_vm1, %v1519_v27, -inf }
  0xc1   :  { %299 = vmax.xlane.f32.xlu0 %v298_v13 }
  0xc6   :  { %v1517_v26 = vpop.f32.mrf.mxu2  ;;  %v1521_v28 = vpop.f32.mrf.mxu3 }
  0xc7   :  { %v328_v29 = vsel %vm261_vm1, %v1517_v26, -inf  ;;  %v352_v31 = vsel %vm261_vm1, %v1521_v28, -inf  ;;  %v1529_v32 = vpop.f32.mrf.mxu0  ;;  %v1533_v34 = vpop.f32.mrf.mxu1 }
  0xc8   :  { %347 = vmax.xlane.f32.xlu1 %v346_v17  ;;  %278 = vmax.xlane.f32.xlu2 %v277_v18  ;;  %v283_v36 = vsel %vm261_vm1, %v1529_v32, -inf  ;;  %v307_v37 = vsel %vm261_vm1, %v1533_v34, -inf }
  0xc9   :  { %326 = vmax.xlane.f32.xlu0 %v325_v19 }
  0xce   :  { %v1531_v33 = vpop.f32.mrf.mxu2  ;;  %v1541_v38 = vpop.f32.mrf.mxu3 }
  0xcf   :  { %v331_v35 = vsel %vm261_vm1, %v1531_v33, -inf  ;;  %v355_v39 = vsel %vm261_vm1, %v1541_v38, -inf }
  0xd0   :  { %302 = vmax.xlane.f32.xlu1 %v301_v23  ;;  %350 = vmax.xlane.f32.xlu2 %v349_v24 }
  0xd1   :  { %281 = vmax.xlane.f32.xlu0 %v280_v25 }
  0xd8   :  { %329 = vmax.xlane.f32.xlu1 %v328_v29  ;;  %305 = vmax.xlane.f32.xlu2 %v304_v30 }
  0xd9   :  { %353 = vmax.xlane.f32.xlu0 %v352_v31 }
  0xe0   :  { %332 = vmax.xlane.f32.xlu2 %v331_v35  ;;  %284 = vmax.xlane.f32.xlu1 %v283_v36 }
  0xe1   :  { %308 = vmax.xlane.f32.xlu0 %v307_v37 }
  0xe8   :  { %356 = vmax.xlane.f32.xlu1 %v355_v39 }
 0x104   :  { %v288_v42 = vpop.xlane.xlu2 %287  ;;  %v264_v43 = vpop.xlane.xlu0 %263 }
 0x105   :  { %v366_v46 = vsub.f32 %v1419_v41, %v288_v42  ;;  %v358_v49 = vsub.f32 %v1417_v40, %v264_v43 }
 0x107   :  { %v406_v52 = vmul.f32 1.442695, %v366_v46  ;;  %v390_v53 = vmul.f32 1.442695, %v358_v49 }
 0x109   :  { %1122 = vpow2.f32 %v406_v52 }
 0x10a   :  { %1124 = vpow2.f32 %v390_v53 }
 0x10b   :  { %v312_v55 = vpop.xlane.xlu1 %311 }
 0x10c   :  { %v374_v57 = vsub.f32 %v1425_v44, %v312_v55  ;;  %v336_v60 = vpop.xlane.xlu0 %335 }
 0x10d   :  { %v382_v61 = vsub.f32 %v1427_v45, %v336_v60 }
 0x10e   :  { %v422_v0 = vmul.f32 1.442695, %v374_v57 }
 0x10f   :  { %v1549_v1 = vpop.eup %1122  ;;  %v438_v2 = vmul.f32 1.442695, %v382_v61 }
 0x110   :  { %v1551_v6 = vpop.eup %1124  ;;  %1126 = vpow2.f32 %v422_v0  ;;  %v478_v40 = vsel %vm261_vm1, %v1549_v1, 0.0 }
 0x111   :  { %1128 = vpow2.f32 %v438_v2  ;;  %v454_v41 = vsel %vm261_vm1, %v1551_v6, 0.0  ;;  %479 = vadd.xlane.f32.xlu1 %v478_v40 }
 0x112   :  { %455 = vadd.xlane.f32.xlu2 %v454_v41 }
 0x113   :  { %v339_v44 = vpop.xlane.xlu1 %338  ;;  %v315_v7 = vpop.xlane.xlu2 %314 }
 0x114   :  { %v375_v45 = vsub.f32 %v1437_v50, %v315_v7  ;;  %v267_v8 = vpop.xlane.xlu0 %266  ;;  %v383_v23 = vsub.f32 %v1439_v51, %v339_v44 }
 0x115   :  { %v359_v11 = vsub.f32 %v1431_v47, %v267_v8 }
 0x116   :  { %v1559_v12 = vpop.eup %1126  ;;  %v424_v13 = vmul.f32 1.442695, %v375_v45  ;;  %v440_v25 = vmul.f32 1.442695, %v383_v23 }
 0x117   :  { %v1561_v17 = vpop.eup %1128  ;;  %v392_v18 = vmul.f32 1.442695, %v359_v11  ;;  %v502_v19 = vsel %vm261_vm1, %v1559_v12, 0.0 }
 0x118   :  { %503 = vadd.xlane.f32.xlu0 %v502_v19  ;;  %v526_v24 = vsel %vm261_vm1, %v1561_v17, 0.0  ;;  %1130 = vpow2.f32 %v424_v13 }
 0x119   :  { %1132 = vpow2.f32 %v392_v18 }
 0x11a   :  { %527 = vadd.xlane.f32.xlu2 %v526_v24  ;;  %1134 = vpow2.f32 %v440_v25 }
 0x11b   :  { %v342_v50 = vpop.xlane.xlu2 %341  ;;  %v270_v47 = vpop.xlane.xlu1 %269 }
 0x11c   :  { %v360_v29 = vsub.f32 %v1445_v54, %v270_v47  ;;  %v291_v30 = vpop.xlane.xlu0 %290  ;;  %v384_v51 = vsub.f32 %v1453_v58, %v342_v50 }
 0x11d   :  { %v367_v31 = vsub.f32 %v1433_v48, %v291_v30 }
 0x11e   :  { %v394_v35 = vmul.f32 1.442695, %v360_v29  ;;  %v1570_v36 = vpop.eup %1130  ;;  %v442_v48 = vmul.f32 1.442695, %v384_v51 }
 0x11f   :  { %v408_v37 = vmul.f32 1.442695, %v367_v31  ;;  %v1573_v39 = vpop.eup %1132  ;;  %v505_v42 = vsel %vm261_vm1, %v1570_v36, 0.0 }
 0x120   :  { %1136 = vpow2.f32 %v394_v35  ;;  %506 = vadd.xlane.f32.xlu1 %v505_v42  ;;  %v457_v54 = vsel %vm261_vm1, %v1573_v39, 0.0  ;;  %v1581_v53 = vpop.eup %1134 }
 0x121   :  { %1138 = vpow2.f32 %v408_v37  ;;  %458 = vadd.xlane.f32.xlu0 %v457_v54 }
 0x122   :  { %1140 = vpow2.f32 %v442_v48 }
 0x123   :  { %v297_v43 = vpop.xlane.xlu2 %296  ;;  %v294_v46 = vpop.xlane.xlu1 %293 }
 0x124   :  { %v368_v49 = vsub.f32 %v1449_v56, %v294_v46  ;;  %v318_v58 = vpop.xlane.xlu0 %317  ;;  %v369_v60 = vsub.f32 %v1463_v63, %v297_v43 }
 0x125   :  { %v376_v52 = vsub.f32 %v1455_v59, %v318_v58  ;;  %v529_v59 = vsel %vm261_vm1, %v1581_v53, 0.0 }
 0x126   :  { %v410_v55 = vmul.f32 1.442695, %v368_v49  ;;  %v1583_v57 = vpop.eup %1136  ;;  %v412_v40 = vmul.f32 1.442695, %v369_v60 }
 0x127   :  { %v426_v61 = vmul.f32 1.442695, %v376_v52  ;;  %v1586_v0 = vpop.eup %1138  ;;  %v460_v2 = vsel %vm261_vm1, %v1583_v57, 0.0 }
 0x128   :  { %1142 = vpow2.f32 %v410_v55  ;;  %461 = vadd.xlane.f32.xlu1 %v460_v2  ;;  %v481_v56 = vsel %vm261_vm1, %v1586_v0, 0.0  ;;  %v1595_v45 = vpop.eup %1140 }
 0x129   :  { %1144 = vpow2.f32 %v426_v61  ;;  %482 = vadd.xlane.f32.xlu2 %v481_v56  ;;  %530 = vadd.xlane.f32.xlu0 %v529_v59  ;;  %v532_v19 = vsel %vm261_vm1, %v1595_v45, 0.0 }
 0x12a   :  { %1146 = vpow2.f32 %v412_v40 }
 0x12b   :  { %v273_v41 = vpop.xlane.xlu1 %272  ;;  %v276_v63 = vpop.xlane.xlu2 %275 }
 0x12c   :  { %v361_v44 = vsub.f32 %v1461_v62, %v273_v41  ;;  %v345_v7 = vpop.xlane.xlu0 %344  ;;  %v362_v35 = vsub.f32 %v1473_v4, %v276_v63 }
 0x12d   :  { %v385_v13 = vsub.f32 %v1475_v5, %v345_v7 }
 0x12e   :  { %v396_v8 = vmul.f32 1.442695, %v361_v44  ;;  %v1597_v11 = vpop.eup %1142 }
 0x12f   :  { %v1600_v18 = vpop.eup %1144  ;;  %v484_v62 = vsel %vm261_vm1, %v1597_v11, 0.0  ;;  %v444_v24 = vmul.f32 1.442695, %v385_v13 }
 0x130   :  { %1148 = vpow2.f32 %v396_v8  ;;  %533 = vadd.xlane.f32.xlu1 %v532_v19  ;;  %v508_v23 = vsel %vm261_vm1, %v1600_v18, 0.0  ;;  %v1610_v30 = vpop.eup %1146 }
 0x131   :  { %509 = vadd.xlane.f32.xlu2 %v508_v23  ;;  %485 = vadd.xlane.f32.xlu0 %v484_v62  ;;  %1150 = vpow2.f32 %v444_v24  ;;  %v487_v54 = vsel %vm261_vm1, %v1610_v30, 0.0 }
 0x133   :  { %v321_v50 = vpop.xlane.xlu1 %320  ;;  %v324_v47 = vpop.xlane.xlu2 %323 }
 0x134   :  { %v377_v5 = vsub.f32 %v1471_v3, %v321_v50  ;;  %v378_v25 = vsub.f32 %v1483_v9, %v324_v47  ;;  %v300_v29 = vpop.xlane.xlu0 %299  ;;  %v398_v9 = vmul.f32 1.442695, %v362_v35 }
 0x135   :  { %v370_v42 = vsub.f32 %v1485_v10, %v300_v29 }
 0x136   :  { %v1612_v31 = vpop.eup %1148  ;;  %v428_v51 = vmul.f32 1.442695, %v377_v5  ;;  %v430_v37 = vmul.f32 1.442695, %v378_v25 }
 0x137   :  { %v463_v3 = vsel %vm261_vm1, %v1612_v31, 0.0  ;;  %v414_v46 = vmul.f32 1.442695, %v370_v42  ;;  %v1621_v58 = vpop.eup %1150 }
 0x138   :  { %1152 = vpow2.f32 %v428_v51  ;;  %488 = vadd.xlane.f32.xlu1 %v487_v54  ;;  %v535_v56 = vsel %vm261_vm1, %v1621_v58, 0.0 }
 0x139   :  { %1154 = vpow2.f32 %v430_v37  ;;  %464 = vadd.xlane.f32.xlu2 %v463_v3 }
 0x13a   :  { %1156 = vpow2.f32 %v398_v9 }
 0x13b   :  { %v348_v48 = vpop.xlane.xlu1 %347  ;;  %v279_v43 = vpop.xlane.xlu2 %278  ;;  %1158 = vpow2.f32 %v414_v46 }
 0x13c   :  { %v363_v4 = vsub.f32 %v1495_v15, %v279_v43  ;;  %v327_v49 = vpop.xlane.xlu0 %326  ;;  %v386_v10 = vsub.f32 %v1493_v14, %v348_v48 }
 0x13d   :  { %v379_v2 = vsub.f32 %v1497_v16, %v327_v49 }
 0x13e   :  { %v1623_v52 = vpop.eup %1152  ;;  %v400_v55 = vmul.f32 1.442695, %v363_v4  ;;  %v446_v59 = vmul.f32 1.442695, %v386_v10 }
 0x13f   :  { %v1626_v60 = vpop.eup %1154  ;;  %v511_v61 = vsel %vm261_vm1, %v1623_v52, 0.0  ;;  %v432_v63 = vmul.f32 1.442695, %v379_v2 }
 0x140   :  { %512 = vadd.xlane.f32.xlu0 %v511_v61  ;;  %v514_v15 = vsel %vm261_vm1, %v1626_v60, 0.0  ;;  %1160 = vpow2.f32 %v400_v55  ;;  %v1635_v41 = vpop.eup %1156 }
 0x141   :  { %515 = vadd.xlane.f32.xlu1 %v514_v15  ;;  %536 = vadd.xlane.f32.xlu2 %v535_v56  ;;  %v1637_v7 = vpop.eup %1158  ;;  %1162 = vpow2.f32 %v446_v59  ;;  %v466_v13 = vsel %vm261_vm1, %v1635_v41, 0.0 }
 0x142   :  { %1164 = vpow2.f32 %v432_v63  ;;  %v490_v62 = vsel %vm261_vm1, %v1637_v7, 0.0 }
 0x143   :  { %v303_v14 = vpop.xlane.xlu1 %302  ;;  %v351_v40 = vpop.xlane.xlu2 %350 }
 0x144   :  { %v282_v44 = vpop.xlane.xlu0 %281  ;;  %v371_v16 = vsub.f32 %v1505_v20, %v303_v14  ;;  %v387_v55 = vsub.f32 %v1507_v21, %v351_v40 }
 0x145   :  { %v364_v19 = vsub.f32 %v1509_v22, %v282_v44 }
 0x146   :  { %v1640_v8 = vpop.eup %1160  ;;  %v416_v24 = vmul.f32 1.442695, %v371_v16  ;;  %v448_v56 = vmul.f32 1.442695, %v387_v55 }
 0x147   :  { %v469_v23 = vsel %vm261_vm1, %v1640_v8, 0.0  ;;  %v1649_v47 = vpop.eup %1162  ;;  %v402_v5 = vmul.f32 1.442695, %v364_v19 }
 0x148   :  { %467 = vadd.xlane.f32.xlu0 %v466_v13  ;;  %v1652_v35 = vpop.eup %1164  ;;  %1166 = vpow2.f32 %v416_v24  ;;  %v538_v37 = vsel %vm261_vm1, %v1649_v47, 0.0 }
 0x149   :  { %470 = vadd.xlane.f32.xlu1 %v469_v23  ;;  %491 = vadd.xlane.f32.xlu2 %v490_v62  ;;  %1168 = vpow2.f32 %v402_v5  ;;  %v517_v42 = vsel %vm261_vm1, %v1652_v35, 0.0 }
 0x14b   :  { %v330_v50 = vpop.xlane.xlu1 %329  ;;  %v306_v20 = vpop.xlane.xlu2 %305 }
 0x14c   :  { %v372_v25 = vsub.f32 %v1519_v27, %v306_v20  ;;  %v354_v29 = vpop.xlane.xlu0 %353  ;;  %v380_v22 = vsub.f32 %v1517_v26, %v330_v50 }
 0x14d   :  { %v388_v15 = vsub.f32 %v1521_v28, %v354_v29 }
 0x14e   :  { %v418_v51 = vmul.f32 1.442695, %v372_v25  ;;  %v434_v54 = vmul.f32 1.442695, %v380_v22  ;;  %v1659_v9 = vpop.eup %1166 }
 0x14f   :  { %v1663_v46 = vpop.eup %1168  ;;  %v493_v2 = vsel %vm261_vm1, %v1659_v9, 0.0  ;;  %v450_v14 = vmul.f32 1.442695, %v388_v15 }
 0x150   :  { %539 = vadd.xlane.f32.xlu0 %v538_v37  ;;  %1170 = vpow2.f32 %v418_v51 }
 0x151   :  { %518 = vadd.xlane.f32.xlu2 %v517_v42  ;;  %1172 = vpow2.f32 %v434_v54 }
 0x153   :  { %v333_v3 = vpop.xlane.xlu2 %332  ;;  %v285_v27 = vpop.xlane.xlu1 %284 }
 0x154   :  { %v381_v48 = vsub.f32 %v1531_v33, %v333_v3  ;;  %v309_v43 = vpop.xlane.xlu0 %308  ;;  %v365_v49 = vsub.f32 %v1529_v32, %v285_v27 }
 0x155   :  { %v373_v26 = vsub.f32 %v1533_v34, %v309_v43  ;;  %v472_v34 = vsel %vm261_vm1, %v1663_v46, 0.0 }
 0x156   :  { %v436_v4 = vmul.f32 1.442695, %v381_v48  ;;  %v1666_v10 = vpop.eup %1170  ;;  %v404_v32 = vmul.f32 1.442695, %v365_v49 }
 0x157   :  { %v420_v61 = vmul.f32 1.442695, %v373_v26  ;;  %v496_v33 = vsel %vm261_vm1, %v1666_v10, 0.0  ;;  %v1676_v59 = vpop.eup %1172 }
 0x158   :  { %1174 = vpow2.f32 %v436_v4  ;;  %494 = vadd.xlane.f32.xlu0 %v493_v2  ;;  %497 = vadd.xlane.f32.xlu1 %v496_v33  ;;  %v520_v63 = vsel %vm261_vm1, %v1676_v59, 0.0 }
 0x159   :  { %1176 = vpow2.f32 %v420_v61  ;;  %473 = vadd.xlane.f32.xlu2 %v472_v34 }
 0x15a   :  { %1178 = vpow2.f32 %v404_v32 }
 0x15b   :  { %v357_v21 = vpop.xlane.xlu1 %356  ;;  %1180 = vpow2.f32 %v448_v56 }
 0x15c   :  { %v389_v28 = vsub.f32 %v1541_v38, %v357_v21  ;;  %1182 = vpow2.f32 %v450_v14 }
 0x15e   :  { %v1678_v40 = vpop.eup %1174  ;;  %v452_v19 = vmul.f32 1.442695, %v389_v28 }
 0x15f   :  { %v523_v44 = vsel %vm261_vm1, %v1678_v40, 0.0  ;;  %v1685_v16 = vpop.eup %1176 }
 0x160   :  { %521 = vadd.xlane.f32.xlu0 %v520_v63  ;;  %524 = vadd.xlane.f32.xlu1 %v523_v44  ;;  %v499_v13 = vsel %vm261_vm1, %v1685_v16, 0.0  ;;  %v1689_v23 = vpop.eup %1178  ;;  %1184 = vpow2.f32 %v452_v19 }
 0x161   :  { %500 = vadd.xlane.f32.xlu2 %v499_v13  ;;  %v1691_v38 = vpop.eup %1180  ;;  %v475_v24 = vsel %vm261_vm1, %v1689_v23, 0.0 }
 0x162   :  { %v1693_v62 = vpop.eup %1182  ;;  %v541_v50 = vsel %vm261_vm1, %v1691_v38, 0.0 }
 0x163   :  { %v544_v20 = vsel %vm261_vm1, %v1693_v62, 0.0 }
 0x166   :  { %v1701_v5 = vpop.eup %1184 }
 0x167   :  { %v547_v25 = vsel %vm261_vm1, %v1701_v5, 0.0 }
 0x168   :  { %476 = vadd.xlane.f32.xlu0 %v475_v24  ;;  %542 = vadd.xlane.f32.xlu1 %v541_v50 }
 0x169   :  { %545 = vadd.xlane.f32.xlu2 %v544_v20 }
 0x170   :  { %548 = vadd.xlane.f32.xlu0 %v547_v25 }
 0x184   :  { %v480_v29 = vpop.xlane.xlu1 %479 }
 0x185   :  { %v456_v22 = vpop.xlane.xlu2 %455  ;;  %1186 = vrcp.f32 %v480_v29  ;;  %v679_v26 = vand.u32 2147483647, %v480_v29  ;;  %v681_v4 = vand.u32 2147483648, %v480_v29  ;;  %vm675_vm5 = vweird.f32 %v480_v29 }
 0x186   :  { %1188 = vrcp.f32 %v456_v22  ;;  %v559_v49 = vand.u32 2147483647, %v456_v22  ;;  %v561_v55 = vand.u32 2147483648, %v456_v22  ;;  %vm555_vm4 = vweird.f32 %v456_v22 }
 0x187   :  { %vm680_vm7 = vcmp.eq.f32.partialorder %v679_v26, 8.507059e+37  ;;  %v682_v32 = vor.u32 1.1754944e-38, %v681_v4 }
 0x188   :  { %vm560_vm9 = vcmp.eq.f32.partialorder %v559_v49, 8.507059e+37  ;;  %v562_v14 = vor.u32 1.1754944e-38, %v561_v55 }
 0x18b   :  { %v1187_v51 = vpop.eup %1186  ;;  %v504_v37 = vpop.xlane.xlu0 %503 }
 0x18c   :  { %v1189_v42 = vpop.eup %1188  ;;  %v671_v54 = vmul.f32 %v1187_v51, %v480_v29  ;;  %1190 = vrcp.f32 %v504_v37  ;;  %vm676_vm2 = vweird.f32 %v1187_v51  ;;  %v799_v63 = vand.u32 2147483647, %v504_v37 }
 0x18d   :  { %v551_v3 = vmul.f32 %v1189_v42, %v456_v22  ;;  %v1705_v27 = vpop.xlane.xlu2 %527  ;;  %vm556_vm3 = vweird.f32 %v1189_v42  ;;  %vm677_vm6 = vmor %vm675_vm5, %vm676_vm2  ;;  %v801_v22 = vand.u32 2147483648, %v504_v37  ;;  %vm795_vm11 = vweird.f32 %v504_v37 }
 0x18e   :  { %v672_v48 = vsub.f32 1.0, %v671_v54  ;;  %1192 = vrcp.f32 %v1705_v27  ;;  %vm557_vm8 = vmor %vm555_vm4, %vm556_vm3  ;;  %vm800_vm14 = vcmp.eq.f32.partialorder %v799_v63, 8.507059e+37  ;;  %vm915_vm15 = vweird.f32 %v1705_v27 }
 0x18f   :  { %v552_v43 = vsub.f32 1.0, %v551_v3 }
 0x190   :  { %v673_v61 = vmul.f32 %v1187_v51, %v672_v48  ;;  %v919_v48 = vand.u32 2147483647, %v1705_v27 }
 0x191   :  { %v553_v2 = vmul.f32 %v1189_v42, %v552_v43  ;;  %v802_v43 = vor.u32 1.1754944e-38, %v801_v22 }
 0x192   :  { %v1191_v15 = vpop.eup %1190  ;;  %v674_v33 = vadd.f32 %v1187_v51, %v673_v61  ;;  %vm920_vm2 = vcmp.eq.f32.partialorder %v919_v48, 8.507059e+37 }
 0x193   :  { %v554_v34 = vadd.f32 %v1189_v42, %v553_v2  ;;  %v791_v56 = vmul.f32 %v1191_v15, %v504_v37  ;;  %v1708_v44 = vpop.xlane.xlu1 %506  ;;  %vm796_vm10 = vweird.f32 %v1191_v15 }
 0x194   :  { %v1193_v21 = vpop.eup %1192  ;;  %v678_v28 = vsel %vm677_vm6, %v1187_v51, %v674_v33  ;;  %v1711_v20 = vpop.xlane.xlu0 %458  ;;  %1194 = vrcp.f32 %v1708_v44  ;;  %vm797_vm13 = vmor %vm795_vm11, %vm796_vm10  ;;  %vm810_vm4 = vweird.f32 %v1708_v44 }
 0x195   :  { %v558_v13 = vsel %vm557_vm8, %v1189_v42, %v554_v34  ;;  %v683_v19 = vsel %vm680_vm7, %v682_v32, %v678_v28  ;;  %v792_v24 = vsub.f32 1.0, %v791_v56  ;;  %v911_v50 = vmul.f32 %v1193_v21, %v1705_v27 }
 0x196   :  { %v563_v25 = vsel %vm560_vm9, %v562_v14, %v558_v13  ;;  %v684_v29 = vmul.f32 %v1549_v1, %v683_v19  ;;  %v921_v42 = vand.u32 2147483648, %v1705_v27  ;;  %1196 = vrcp.f32 %v1711_v20 }
 0x197   :  { %v564_v54 = vmul.f32 %v1551_v6, %v563_v25  ;;  %v793_v3 = vmul.f32 %v1191_v15, %v792_v24  ;;  %v912_v51 = vsub.f32 1.0, %v911_v50  ;;  %vm916_vm12 = vweird.f32 %v1193_v21 }
 0x198   :  { %1038 = vst.msk [vmem:[%s2208_s2 + $0x40] sm:$0xff] %vm261_vm1, %v684_v29  ;;  %vm917_vm0 = vmor %vm915_vm15, %vm916_vm12  ;;  %v922_v55 = vor.u32 1.1754944e-38, %v921_v42  ;;  %v814_v14 = vand.u32 2147483647, %v1708_v44  ;;  %v574_v13 = vand.u32 2147483647, %v1711_v20  ;;  %vm570_vm6 = vweird.f32 %v1711_v20 }
 0x199   :  { %1030 = vst.msk [vmem:[%s2208_s2] sm:$0xff] %vm261_vm1, %v564_v54  ;;  %v794_v1 = vadd.f32 %v1191_v15, %v793_v3  ;;  %v913_v6 = vmul.f32 %v1193_v21, %v912_v51  ;;  %v576_v19 = vand.u32 2147483648, %v1711_v20 }
 0x19a   :  { %v1195_v37 = vpop.eup %1194  ;;  %vm1754_vm5 = vcmp.eq.f32.partialorder %v814_v14, 8.507059e+37  ;;  %vm1760_vm9 = vcmp.eq.f32.partialorder %v574_v13, 8.507059e+37 }
 0x19b   :  { %v798_v26 = vsel %vm797_vm13, %v1191_v15, %v794_v1  ;;  %v914_v4 = vadd.f32 %v1193_v21, %v913_v6  ;;  %v1728_v61 = vpop.xlane.xlu1 %461  ;;  %v806_v34 = vmul.f32 %v1195_v37, %v1708_v44  ;;  %vm811_vm3 = vweird.f32 %v1195_v37 }
 0x19c   :  { %v803_v49 = vsel %vm800_vm14, %v802_v43, %v798_v26  ;;  %v1732_v32 = vpop.xlane.xlu2 %482  ;;  %v1197_v56 = vpop.eup %1196  ;;  %1198 = vrcp.f32 %v1728_v61  ;;  %v589_v50 = vand.u32 2147483647, %v1728_v61  ;;  %vm812_vm8 = vmor %vm810_vm4, %vm811_vm3  ;;  %v577_v42 = vor.u32 1.1754944e-38, %v576_v19 }
 0x19d   :  { %v804_v2 = vmul.f32 %v1559_v12, %v803_v49  ;;  %v918_v33 = vsel %vm917_vm0, %v1193_v21, %v914_v4  ;;  %v807_v12 = vsub.f32 1.0, %v806_v34  ;;  %v816_v21 = vand.u32 2147483648, %v1708_v44  ;;  %v1743_v63 = vpop.xlane.xlu0 %530 }
 0x19e   :  { %v923_v15 = vsel %vm920_vm2, %v922_v55, %v918_v33  ;;  %v566_v28 = vmul.f32 %v1197_v56, %v1711_v20  ;;  %1200 = vrcp.f32 %v1732_v32  ;;  %vm571_vm7 = vweird.f32 %v1197_v56 }
 0x19f   :  { %1046 = vst.msk [vmem:[%s2208_s2 + $0x80] sm:$0xff] %vm261_vm1, %v804_v2  ;;  %v924_v27 = vmul.f32 %v1561_v17, %v923_v15  ;;  %v808_v24 = vmul.f32 %v1195_v37, %v807_v12  ;;  %1202 = vrcp.f32 %v1743_v63  ;;  %v817_v22 = vor.u32 1.1754944e-38, %v816_v21  ;;  %vm572_vm13 = vmor %vm570_vm6, %vm571_vm7 }
 0x1a0   :  { %v567_v17 = vsub.f32 1.0, %v566_v28  ;;  %vm585_vm10 = vweird.f32 %v1728_v61  ;;  %v591_v44 = vand.u32 2147483648, %v1728_v61  ;;  %vm1769_vm11 = vcmp.eq.f32.partialorder %v589_v50, 8.507059e+37 }
 0x1a1   :  { %1054 = vst.msk [vmem:[%s2208_s2 + $0xc0] sm:$0xff] %vm261_vm1, %v924_v27  ;;  %v809_v29 = vadd.f32 %v1195_v37, %v808_v24  ;;  %vm690_vm12 = vweird.f32 %v1732_v32  ;;  %v696_v2 = vand.u32 2147483648, %v1732_v32  ;;  %v934_v20 = vand.u32 2147483647, %v1743_v63 }
 0x1a2   :  { %v568_v54 = vmul.f32 %v1197_v56, %v567_v17  ;;  %v1199_v3 = vpop.eup %1198  ;;  %v592_v21 = vor.u32 1.1754944e-38, %v591_v44  ;;  %vm930_vm0 = vweird.f32 %v1743_v63  ;;  %v936_v17 = vand.u32 2147483648, %v1743_v63 }
 0x1a3   :  { %v1766_v1 = vpop.xlane.xlu1 %533  ;;  %v813_v6 = vsel %vm812_vm8, %v1195_v37, %v809_v29  ;;  %v581_v43 = vmul.f32 %v1199_v3, %v1728_v61  ;;  %v694_v37 = vand.u32 2147483647, %v1732_v32  ;;  %vm586_vm14 = vweird.f32 %v1199_v3 }
 0x1a4   :  { %v569_v48 = vadd.f32 %v1197_v56, %v568_v54  ;;  %v1774_v4 = vpop.xlane.xlu2 %509  ;;  %v1201_v49 = vpop.eup %1200  ;;  %v818_v55 = vsel %vm1754_vm5, %v817_v22, %v813_v6  ;;  %1204 = vrcp.f32 %v1766_v1  ;;  %vm587_vm3 = vmor %vm585_vm10, %vm586_vm14  ;;  %v697_v22 = vor.u32 1.1754944e-38, %v696_v2 }
 0x1a5   :  { %v819_v33 = vmul.f32 %v1570_v36, %v818_v55  ;;  %v582_v15 = vsub.f32 1.0, %v581_v43  ;;  %v686_v14 = vmul.f32 %v1201_v49, %v1732_v32  ;;  %v1203_v27 = vpop.eup %1202  ;;  %v1795_v19 = vpop.xlane.xlu0 %485  ;;  %vm1797_vm15 = vcmp.eq.f32.partialorder %v694_v37, 8.507059e+37 }
 0x1a6   :  { %v573_v34 = vsel %vm572_vm13, %v1197_v56, %v569_v48  ;;  %v926_v13 = vmul.f32 %v1203_v27, %v1743_v63  ;;  %1206 = vrcp.f32 %v1774_v4  ;;  %vm691_vm2 = vweird.f32 %v1201_v49 }
 0x1a7   :  { %v578_v12 = vsel %vm1760_vm9, %v577_v42, %v573_v34  ;;  %1047 = vst.msk [vmem:[%s2208_s2 + $0x88] sm:$0xff] %vm261_vm1, %v819_v33  ;;  %v583_v36 = vmul.f32 %v1199_v3, %v582_v15  ;;  %v687_v56 = vsub.f32 1.0, %v686_v14  ;;  %vm931_vm4 = vweird.f32 %v1203_v27  ;;  %vm692_vm6 = vmor %vm690_vm12, %vm691_vm2 }
 0x1a8   :  { %v579_v28 = vmul.f32 %v1573_v39, %v578_v12  ;;  %v927_v25 = vsub.f32 1.0, %v926_v13  ;;  %vm1811_vm5 = vcmp.eq.f32.partialorder %v934_v20, 8.507059e+37  ;;  %1208 = vrcp.f32 %v1795_v19  ;;  %vm932_vm7 = vmor %vm930_vm0, %vm931_vm4 }
 0x1a9   :  { %v584_v39 = vadd.f32 %v1199_v3, %v583_v36  ;;  %v688_v50 = vmul.f32 %v1201_v49, %v687_v56  ;;  %v937_v61 = vor.u32 1.1754944e-38, %v936_v17  ;;  %v949_v55 = vand.u32 2147483647, %v1766_v1 }
 0x1aa   :  { %1031 = vst.msk [vmem:[%s2208_s2 + $0x8] sm:$0xff] %vm261_vm1, %v579_v28  ;;  %v1205_v29 = vpop.eup %1204  ;;  %v928_v44 = vmul.f32 %v1203_v27, %v927_v25  ;;  %v951_v37 = vand.u32 2147483648, %v1766_v1  ;;  %vm945_vm8 = vweird.f32 %v1766_v1  ;;  %v829_v24 = vand.u32 2147483647, %v1774_v4 }
 0x1ab   :  { %v588_v51 = vsel %vm587_vm3, %v1199_v3, %v584_v39  ;;  %v689_v42 = vadd.f32 %v1201_v49, %v688_v50  ;;  %v941_v6 = vmul.f32 %v1205_v29, %v1766_v1  ;;  %v1817_v48 = vpop.xlane.xlu1 %488  ;;  %vm946_vm9 = vweird.f32 %v1205_v29 }
 0x1ac   :  { %v593_v43 = vsel %vm1769_vm11, %v592_v21, %v588_v51  ;;  %v929_v33 = vadd.f32 %v1203_v27, %v928_v44  ;;  %v1826_v15 = vpop.xlane.xlu2 %464  ;;  %v1207_v14 = vpop.eup %1206  ;;  %1210 = vrcp.f32 %v1817_v48  ;;  %vm1843_vm10 = vcmp.eq.f32.partialorder %v949_v55, 8.507059e+37  ;;  %vm947_vm12 = vmor %vm945_vm8, %vm946_vm9 }
 0x1ad   :  { %v594_v2 = vmul.f32 %v1583_v57, %v593_v43  ;;  %v693_v3 = vsel %vm692_vm6, %v1201_v49, %v689_v42  ;;  %v942_v34 = vsub.f32 1.0, %v941_v6  ;;  %v821_v12 = vmul.f32 %v1207_v14, %v1774_v4 }
 0x1ae   :  { %v698_v26 = vsel %vm1797_vm15, %v697_v22, %v693_v3  ;;  %v933_v32 = vsel %vm932_vm7, %v1203_v27, %v929_v33  ;;  %v1209_v21 = vpop.eup %1208  ;;  %v952_v28 = vor.u32 1.1754944e-38, %v951_v37  ;;  %vm825_vm11 = vweird.f32 %v1774_v4 }
 0x1af   :  { %1032 = vst.msk [vmem:[%s2208_s2 + $0x10] sm:$0xff] %vm261_vm1, %v594_v2  ;;  %v699_v57 = vmul.f32 %v1586_v0, %v698_v26  ;;  %v943_v49 = vmul.f32 %v1205_v29, %v942_v34  ;;  %v938_v63 = vsel %vm1811_vm5, %v937_v61, %v933_v32  ;;  %v822_v36 = vsub.f32 1.0, %v821_v12 }
 0x1b0   :  { %v939_v0 = vmul.f32 %v1581_v53, %v938_v63  ;;  %v701_v56 = vmul.f32 %v1209_v21, %v1795_v19  ;;  %vm826_vm13 = vweird.f32 %v1207_v14  ;;  %v831_v17 = vand.u32 2147483648, %v1774_v4 }
 0x1b1   :  { %1039 = vst.msk [vmem:[%s2208_s2 + $0x48] sm:$0xff] %vm261_vm1, %v699_v57  ;;  %v944_v27 = vadd.f32 %v1205_v29, %v943_v49  ;;  %vm705_vm14 = vweird.f32 %v1795_v19  ;;  %v823_v39 = vmul.f32 %v1207_v14, %v822_v36  ;;  %1212 = vrcp.f32 %v1826_v15  ;;  %vm827_vm0 = vmor %vm825_vm11, %vm826_vm13 }
 0x1b2   :  { %1055 = vst.msk [vmem:[%s2208_s2 + $0xc8] sm:$0xff] %vm261_vm1, %v939_v0  ;;  %v702_v50 = vsub.f32 1.0, %v701_v56  ;;  %v1211_v25 = vpop.eup %1210  ;;  %vm706_vm15 = vweird.f32 %v1209_v21  ;;  %v709_v22 = vand.u32 2147483647, %v1795_v19  ;;  %v711_v54 = vand.u32 2147483648, %v1795_v19 }
 0x1b3   :  { %v1854_v13 = vpop.xlane.xlu0 %512  ;;  %v948_v53 = vsel %vm947_vm12, %v1205_v29, %v944_v27  ;;  %v824_v42 = vadd.f32 %v1207_v14, %v823_v39  ;;  %v716_v6 = vmul.f32 %v1211_v25, %v1817_v48  ;;  %vm830_vm2 = vcmp.eq.f32.partialorder %v829_v24, 8.507059e+37  ;;  %vm707_vm3 = vmor %vm705_vm14, %vm706_vm15 }
 0x1b4   :  { %v953_v1 = vsel %vm1843_vm10, %v952_v28, %v948_v53  ;;  %v703_v44 = vmul.f32 %v1209_v21, %v702_v50  ;;  %v832_v29 = vor.u32 1.1754944e-38, %v831_v17  ;;  %v724_v43 = vand.u32 2147483647, %v1817_v48  ;;  %v1883_v2 = vpop.xlane.xlu2 %536  ;;  %v1888_v33 = vpop.xlane.xlu1 %515 }
 0x1b5   :  { %v954_v51 = vmul.f32 %v1595_v45, %v953_v1  ;;  %1214 = vrcp.f32 %v1854_v13  ;;  %v828_v45 = vsel %vm827_vm0, %v1207_v14, %v824_v42  ;;  %v717_v55 = vsub.f32 1.0, %v716_v6 }
 0x1b6   :  { %v704_v61 = vadd.f32 %v1209_v21, %v703_v44  ;;  %v726_v37 = vand.u32 2147483648, %v1817_v48  ;;  %v833_v4 = vsel %vm830_vm2, %v832_v29, %v828_v45  ;;  %vm710_vm4 = vcmp.eq.f32.partialorder %v709_v22, 8.507059e+37 }
 0x1b7   :  { %1056 = vst.msk [vmem:[%s2208_s2 + $0xd0] sm:$0xff] %vm261_vm1, %v954_v51  ;;  %v712_v3 = vor.u32 1.1754944e-38, %v711_v54  ;;  %v1213_v34 = vpop.eup %1212  ;;  %v834_v26 = vmul.f32 %v1600_v18, %v833_v4  ;;  %v718_v14 = vmul.f32 %v1211_v25, %v717_v55  ;;  %vm721_vm5 = vweird.f32 %v1211_v25 }
 0x1b8   :  { %v708_v57 = vsel %vm707_vm3, %v1209_v21, %v704_v61  ;;  %vm720_vm6 = vweird.f32 %v1817_v48  ;;  %vm1892_vm7 = vcmp.eq.f32.partialorder %v724_v43, 8.507059e+37  ;;  %v596_v19 = vmul.f32 %v1213_v34, %v1826_v15 }
 0x1b9   :  { %v713_v32 = vsel %vm710_vm4, %v712_v3, %v708_v57  ;;  %1048 = vst.msk [vmem:[%s2208_s2 + $0x90] sm:$0xff] %vm261_vm1, %v834_v26  ;;  %v719_v18 = vadd.f32 %v1211_v25, %v718_v14  ;;  %v727_v21 = vor.u32 1.1754944e-38, %v726_v37  ;;  %1216 = vrcp.f32 %v1888_v33  ;;  %vm722_vm8 = vmor %vm720_vm6, %vm721_vm5 }
 0x1ba   :  { %v714_v12 = vmul.f32 %v1597_v11, %v713_v32  ;;  %v597_v20 = vsub.f32 1.0, %v596_v19  ;;  %vm600_vm9 = vweird.f32 %v1826_v15  ;;  %v604_v28 = vand.u32 2147483647, %v1826_v15 }
 0x1bb   :  { %v1903_v63 = vpop.xlane.xlu0 %467  ;;  %v1215_v48 = vpop.eup %1214  ;;  %v606_v0 = vand.u32 2147483648, %v1826_v15  ;;  %v723_v11 = vsel %vm722_vm8, %v1211_v25, %v719_v18  ;;  %v844_v36 = vand.u32 2147483647, %v1854_v13  ;;  %1218 = vrcp.f32 %v1883_v2 }
 0x1bc   :  { %1040 = vst.msk [vmem:[%s2208_s2 + $0x50] sm:$0xff] %vm261_vm1, %v714_v12  ;;  %v836_v27 = vmul.f32 %v1215_v48, %v1854_v13  ;;  %v728_v56 = vsel %vm1892_vm7, %v727_v21, %v723_v11  ;;  %v598_v24 = vmul.f32 %v1213_v34, %v597_v20  ;;  %vm601_vm10 = vweird.f32 %v1213_v34  ;;  %v1937_v44 = vpop.xlane.xlu2 %491  ;;  %v1941_v45 = vpop.xlane.xlu1 %470 }
 0x1bd   :  { %v846_v17 = vand.u32 2147483648, %v1854_v13  ;;  %v729_v53 = vmul.f32 %v1610_v30, %v728_v56  ;;  %v859_v50 = vand.u32 2147483647, %v1888_v33  ;;  %v861_v25 = vand.u32 2147483648, %v1888_v33  ;;  %vm602_vm13 = vmor %vm600_vm9, %vm601_vm10 }
 0x1be   :  { %v837_v39 = vsub.f32 1.0, %v836_v27  ;;  %v599_v1 = vadd.f32 %v1213_v34, %v598_v24  ;;  %vm1921_vm11 = vcmp.eq.f32.partialorder %v604_v28, 8.507059e+37  ;;  %vm840_vm12 = vweird.f32 %v1854_v13 }
 0x1bf   :  { %1220 = vrcp.f32 %v1903_v63  ;;  %v1217_v54 = vpop.eup %1216  ;;  %1041 = vst.msk [vmem:[%s2208_s2 + $0x58] sm:$0xff] %vm261_vm1, %v729_v53  ;;  %v607_v30 = vor.u32 1.1754944e-38, %v606_v0  ;;  %vm841_vm14 = vweird.f32 %v1215_v48  ;;  %vm1933_vm15 = vcmp.eq.f32.partialorder %v844_v36, 8.507059e+37 }
 0x1c0   :  { %v838_v51 = vmul.f32 %v1215_v48, %v837_v39  ;;  %v603_v6 = vsel %vm602_vm13, %v1213_v34, %v599_v1  ;;  %v847_v29 = vor.u32 1.1754944e-38, %v846_v17  ;;  %v851_v43 = vmul.f32 %v1217_v54, %v1888_v33  ;;  %vm842_vm3 = vmor %vm840_vm12, %vm841_vm14 }
 0x1c1   :  { %vm855_vm0 = vweird.f32 %v1888_v33  ;;  %v1219_v61 = vpop.eup %1218  ;;  %v608_v15 = vsel %vm1921_vm11, %v607_v30, %v603_v6  ;;  %vm1945_vm2 = vcmp.eq.f32.partialorder %v859_v50, 8.507059e+37  ;;  %v862_v4 = vor.u32 1.1754944e-38, %v861_v25 }
 0x1c2   :  { %v839_v55 = vadd.f32 %v1215_v48, %v838_v51  ;;  %v609_v3 = vmul.f32 %v1612_v31, %v608_v15  ;;  %v852_v34 = vsub.f32 1.0, %v851_v43  ;;  %v956_v26 = vmul.f32 %v1219_v61, %v1883_v2 }
 0x1c3   :  { %vm960_vm4 = vweird.f32 %v1883_v2  ;;  %v964_v14 = vand.u32 2147483647, %v1883_v2  ;;  %v966_v32 = vand.u32 2147483648, %v1883_v2  ;;  %1222 = vrcp.f32 %v1941_v45  ;;  %v1957_v49 = vpop.xlane.xlu0 %539 }
 0x1c4   :  { %v843_v57 = vsel %vm842_vm3, %v1215_v48, %v839_v55  ;;  %1033 = vst.msk [vmem:[%s2208_s2 + $0x18] sm:$0xff] %vm261_vm1, %v609_v3  ;;  %v853_v13 = vmul.f32 %v1217_v54, %v852_v34  ;;  %vm856_vm5 = vweird.f32 %v1217_v54  ;;  %v957_v12 = vsub.f32 1.0, %v956_v26  ;;  %v1988_v50 = vpop.xlane.xlu2 %518 }
 0x1c5   :  { %v1221_v19 = vpop.eup %1220  ;;  %v848_v31 = vsel %vm1933_vm15, %v847_v29, %v843_v57  ;;  %vm615_vm6 = vweird.f32 %v1903_v63  ;;  %v619_v48 = vand.u32 2147483647, %v1903_v63  ;;  %vm961_vm7 = vweird.f32 %v1219_v61  ;;  %vm857_vm8 = vmor %vm855_vm0, %vm856_vm5 }
 0x1c6   :  { %v849_v18 = vmul.f32 %v1623_v52, %v848_v31  ;;  %v611_v21 = vmul.f32 %v1221_v19, %v1903_v63  ;;  %v854_v20 = vadd.f32 %v1217_v54, %v853_v13  ;;  %v958_v28 = vmul.f32 %v1219_v61, %v957_v12  ;;  %vm962_vm10 = vmor %vm960_vm4, %vm961_vm7 }
 0x1c7   :  { %1224 = vrcp.f32 %v1937_v44  ;;  %vm1976_vm9 = vcmp.eq.f32.partialorder %v964_v14, 8.507059e+37  ;;  %v967_v0 = vor.u32 1.1754944e-38, %v966_v32  ;;  %v621_v27 = vand.u32 2147483648, %v1903_v63 }
 0x1c8   :  { %1049 = vst.msk [vmem:[%s2208_s2 + $0x98] sm:$0xff] %vm261_vm1, %v849_v18  ;;  %v612_v11 = vsub.f32 1.0, %v611_v21  ;;  %v858_v36 = vsel %vm857_vm8, %v1217_v54, %v854_v20  ;;  %v959_v56 = vadd.f32 %v1219_v61, %v958_v28  ;;  %v634_v24 = vand.u32 2147483647, %v1941_v45 }
 0x1c9   :  { %1226 = vrcp.f32 %v1957_v49  ;;  %v1223_v17 = vpop.eup %1222  ;;  %v863_v53 = vsel %vm1945_vm2, %v862_v4, %v858_v36  ;;  %vm616_vm11 = vweird.f32 %v1221_v19  ;;  %v636_v39 = vand.u32 2147483648, %v1941_v45 }
 0x1ca   :  { %v613_v33 = vmul.f32 %v1221_v19, %v612_v11  ;;  %v864_v25 = vmul.f32 %v1626_v60, %v863_v53  ;;  %v963_v1 = vsel %vm962_vm10, %v1219_v61, %v959_v56  ;;  %vm1991_vm12 = vcmp.eq.f32.partialorder %v619_v48, 8.507059e+37  ;;  %vm617_vm14 = vmor %vm615_vm6, %vm616_vm11 }
 0x1cb   :  { %v626_v54 = vmul.f32 %v1223_v17, %v1941_v45  ;;  %v968_v30 = vsel %vm1976_vm9, %v967_v0, %v963_v1  ;;  %v622_v51 = vor.u32 1.1754944e-38, %v621_v27  ;;  %vm630_vm13 = vweird.f32 %v1941_v45  ;;  %v2013_v55 = vpop.xlane.xlu0 %494  ;;  %v2025_v14 = vpop.xlane.xlu1 %497 }
 0x1cc   :  { %v614_v2 = vadd.f32 %v1221_v19, %v613_v33  ;;  %1050 = vst.msk [vmem:[%s2208_s2 + $0xa0] sm:$0xff] %vm261_vm1, %v864_v25  ;;  %v969_v60 = vmul.f32 %v1621_v58, %v968_v30  ;;  %vm2006_vm15 = vcmp.eq.f32.partialorder %v634_v24, 8.507059e+37  ;;  %1228 = vrcp.f32 %v1988_v50  ;;  %v2045_v52 = vpop.xlane.xlu2 %473 }
 0x1cd   :  { %v1225_v42 = vpop.eup %1224  ;;  %v627_v6 = vsub.f32 1.0, %v626_v54  ;;  %v637_v61 = vor.u32 1.1754944e-38, %v636_v39  ;;  %vm735_vm0 = vweird.f32 %v1937_v44  ;;  %vm631_vm2 = vweird.f32 %v1223_v17 }
 0x1ce   :  { %v618_v43 = vsel %vm617_vm14, %v1221_v19, %v614_v2  ;;  %v731_v15 = vmul.f32 %v1225_v42, %v1937_v44  ;;  %1057 = vst.msk [vmem:[%s2208_s2 + $0xd8] sm:$0xff] %vm261_vm1, %v969_v60  ;;  %v739_v4 = vand.u32 2147483647, %v1937_v44  ;;  %v741_v26 = vand.u32 2147483648, %v1937_v44  ;;  %vm632_vm4 = vmor %vm630_vm13, %vm631_vm2 }
 0x1cf   :  { %v1227_v37 = vpop.eup %1226  ;;  %v623_v58 = vsel %vm1991_vm12, %v622_v51, %v618_v43  ;;  %v628_v63 = vmul.f32 %v1223_v17, %v627_v6  ;;  %vm975_vm3 = vweird.f32 %v1957_v49  ;;  %v979_v19 = vand.u32 2147483647, %v1957_v49 }
 0x1d0   :  { %v624_v3 = vmul.f32 %v1635_v41, %v623_v58  ;;  %v732_v34 = vsub.f32 1.0, %v731_v15  ;;  %v971_v57 = vmul.f32 %v1227_v37, %v1957_v49  ;;  %1230 = vrcp.f32 %v2013_v55 }
 0x1d1   :  { %v629_v32 = vadd.f32 %v1223_v17, %v628_v63  ;;  %vm736_vm5 = vweird.f32 %v1225_v42  ;;  %v981_v13 = vand.u32 2147483648, %v1957_v49  ;;  %vm2037_vm6 = vcmp.eq.f32.partialorder %v739_v4, 8.507059e+37 }
 0x1d2   :  { %1034 = vst.msk [vmem:[%s2208_s2 + $0x20] sm:$0xff] %vm261_vm1, %v624_v3  ;;  %v733_v41 = vmul.f32 %v1225_v42, %v732_v34  ;;  %v972_v31 = vsub.f32 1.0, %v971_v57  ;;  %v1229_v12 = vpop.eup %1228  ;;  %vm976_vm7 = vweird.f32 %v1227_v37  ;;  %1232 = vrcp.f32 %v2025_v14  ;;  %vm737_vm8 = vmor %vm735_vm0, %vm736_vm5 }
 0x1d3   :  { %v633_v18 = vsel %vm632_vm4, %v1223_v17, %v629_v32  ;;  %v866_v28 = vmul.f32 %v1229_v12, %v1988_v50  ;;  %v742_v11 = vor.u32 1.1754944e-38, %v741_v26  ;;  %vm2050_vm9 = vcmp.eq.f32.partialorder %v979_v19, 8.507059e+37  ;;  %vm977_vm10 = vmor %vm975_vm3, %vm976_vm7  ;;  %v2076_v51 = vpop.xlane.xlu0 %521 }
 0x1d4   :  { %v638_v48 = vsel %vm2006_vm15, %v637_v61, %v633_v18  ;;  %v734_v20 = vadd.f32 %v1225_v42, %v733_v41  ;;  %v973_v45 = vmul.f32 %v1227_v37, %v972_v31  ;;  %v874_v36 = vand.u32 2147483647, %v1988_v50 }
 0x1d5   :  { %v639_v0 = vmul.f32 %v1640_v8, %v638_v48  ;;  %v982_v17 = vor.u32 1.1754944e-38, %v981_v13  ;;  %v867_v53 = vsub.f32 1.0, %v866_v28  ;;  %vm871_vm11 = vweird.f32 %v1229_v12 }
 0x1d6   :  { %v738_v56 = vsel %vm737_vm8, %v1225_v42, %v734_v20  ;;  %v974_v24 = vadd.f32 %v1227_v37, %v973_v45  ;;  %v1231_v33 = vpop.eup %1230  ;;  %v876_v44 = vand.u32 2147483648, %v1988_v50  ;;  %1234 = vrcp.f32 %v2045_v52 }
 0x1d7   :  { %1035 = vst.msk [vmem:[%s2208_s2 + $0x28] sm:$0xff] %vm261_vm1, %v639_v0  ;;  %v743_v8 = vsel %vm2037_vm6, %v742_v11, %v738_v56  ;;  %v868_v1 = vmul.f32 %v1229_v12, %v867_v53  ;;  %v746_v22 = vmul.f32 %v1231_v33, %v2013_v55  ;;  %vm870_vm12 = vweird.f32 %v1988_v50 }
 0x1d8   :  { %v744_v39 = vmul.f32 %v1637_v7, %v743_v8  ;;  %v978_v25 = vsel %vm977_vm10, %v1227_v37, %v974_v24  ;;  %v1233_v54 = vpop.eup %1232  ;;  %vm2071_vm13 = vcmp.eq.f32.partialorder %v874_v36, 8.507059e+37  ;;  %v754_v2 = vand.u32 2147483647, %v2013_v55  ;;  %vm872_vm14 = vmor %vm870_vm12, %vm871_vm11  ;;  %v2092_v37 = vpop.xlane.xlu1 %524 }
 0x1d9   :  { %v983_v30 = vsel %vm2050_vm9, %v982_v17, %v978_v25  ;;  %v869_v42 = vadd.f32 %v1229_v12, %v868_v1  ;;  %v747_v60 = vsub.f32 1.0, %v746_v22  ;;  %v761_v6 = vmul.f32 %v1233_v54, %v2025_v14 }
 0x1da   :  { %1042 = vst.msk [vmem:[%s2208_s2 + $0x60] sm:$0xff] %vm261_vm1, %v744_v39  ;;  %v984_v7 = vmul.f32 %v1649_v47, %v983_v30  ;;  %v877_v50 = vor.u32 1.1754944e-38, %v876_v44  ;;  %vm751_vm15 = vweird.f32 %v1231_v33  ;;  %v756_v29 = vand.u32 2147483648, %v2013_v55 }
 0x1db   :  { %v769_v43 = vand.u32 2147483647, %v2025_v14  ;;  %v873_v61 = vsel %vm872_vm14, %v1229_v12, %v869_v42  ;;  %v748_v15 = vmul.f32 %v1231_v33, %v747_v60  ;;  %v762_v47 = vsub.f32 1.0, %v761_v6  ;;  %v2114_v0 = vpop.xlane.xlu0 %476 }
 0x1dc   :  { %1058 = vst.msk [vmem:[%s2208_s2 + $0xe0] sm:$0xff] %vm261_vm1, %v984_v7  ;;  %1236 = vrcp.f32 %v2076_v51  ;;  %v1235_v58 = vpop.eup %1234  ;;  %v878_v63 = vsel %vm2071_vm13, %v877_v50, %v873_v61  ;;  %vm750_vm0 = vweird.f32 %v2013_v55  ;;  %vm766_vm2 = vweird.f32 %v1233_v54 }
 0x1dd   :  { %v771_v4 = vand.u32 2147483648, %v2025_v14  ;;  %v879_v3 = vmul.f32 %v1652_v35, %v878_v63  ;;  %v749_v34 = vadd.f32 %v1231_v33, %v748_v15  ;;  %v763_v26 = vmul.f32 %v1233_v54, %v762_v47  ;;  %vm752_vm3 = vmor %vm750_vm0, %vm751_vm15 }
 0x1de   :  { %v641_v57 = vmul.f32 %v1235_v58, %v2045_v52  ;;  %vm755_vm4 = vcmp.eq.f32.partialorder %v754_v2, 8.507059e+37  ;;  %v757_v32 = vor.u32 1.1754944e-38, %v756_v29  ;;  %vm765_vm5 = vweird.f32 %v2025_v14  ;;  %v2110_v14 = vpop.xlane.xlu2 %500 }
 0x1df   :  { %1238 = vrcp.f32 %v2092_v37  ;;  %1051 = vst.msk [vmem:[%s2208_s2 + $0xa8] sm:$0xff] %vm261_vm1, %v879_v3  ;;  %v753_v55 = vsel %vm752_vm3, %v1231_v33, %v749_v34  ;;  %v764_v19 = vadd.f32 %v1233_v54, %v763_v26  ;;  %vm770_vm6 = vcmp.eq.f32.partialorder %v769_v43, 8.507059e+37  ;;  %vm767_vm7 = vmor %vm765_vm5, %vm766_vm2 }
 0x1e0   :  { %v642_v35 = vsub.f32 1.0, %v641_v57  ;;  %v758_v41 = vsel %vm755_vm4, %v757_v32, %v753_v55  ;;  %v772_v31 = vor.u32 1.1754944e-38, %v771_v4  ;;  %v649_v13 = vand.u32 2147483647, %v2045_v52 }
 0x1e1   :  { %v651_v12 = vand.u32 2147483648, %v2045_v52  ;;  %v759_v21 = vmul.f32 %v1659_v9, %v758_v41  ;;  %v768_v48 = vsel %vm767_vm7, %v1233_v54, %v764_v19  ;;  %vm646_vm8 = vweird.f32 %v1235_v58 }
 0x1e2   :  { %v1237_v18 = vpop.eup %1236  ;;  %v643_v20 = vmul.f32 %v1235_v58, %v642_v35  ;;  %v773_v45 = vsel %vm770_vm6, %v772_v31, %v768_v48  ;;  %vm645_vm9 = vweird.f32 %v2045_v52  ;;  %1240 = vrcp.f32 %v2110_v14  ;;  %v2130_v52 = vpop.xlane.xlu1 %542 }
 0x1e3   :  { %v881_v28 = vmul.f32 %v1237_v18, %v2076_v51  ;;  %1043 = vst.msk [vmem:[%s2208_s2 + $0x68] sm:$0xff] %vm261_vm1, %v759_v21  ;;  %v774_v11 = vmul.f32 %v1666_v10, %v773_v45  ;;  %vm647_vm10 = vmor %vm645_vm9, %vm646_vm8  ;;  %vm650_vm11 = vcmp.eq.f32.partialorder %v649_v13, 8.507059e+37  ;;  %v652_v36 = vor.u32 1.1754944e-38, %v651_v12 }
 0x1e4   :  { %v644_v27 = vadd.f32 %v1235_v58, %v643_v20  ;;  %v891_v17 = vand.u32 2147483648, %v2076_v51  ;;  %1242 = vrcp.f32 %v2114_v0  ;;  %vm886_vm12 = vweird.f32 %v1237_v18 }
 0x1e5   :  { %v1239_v9 = vpop.eup %1238  ;;  %v882_v56 = vsub.f32 1.0, %v881_v28  ;;  %1044 = vst.msk [vmem:[%s2208_s2 + $0x70] sm:$0xff] %vm261_vm1, %v774_v11  ;;  %v889_v8 = vand.u32 2147483647, %v2076_v51  ;;  %v904_v25 = vand.u32 2147483647, %v2092_v37  ;;  %vm885_vm13 = vweird.f32 %v2076_v51 }
 0x1e6   :  { %v648_v24 = vsel %vm647_vm10, %v1235_v58, %v644_v27  ;;  %v896_v10 = vmul.f32 %v1239_v9, %v2092_v37  ;;  %v906_v1 = vand.u32 2147483648, %v2092_v37  ;;  %1244 = vrcp.f32 %v2130_v52  ;;  %vm887_vm14 = vmor %vm885_vm13, %vm886_vm12  ;;  %v2144_v7 = vpop.xlane.xlu2 %545 }
 0x1e7   :  { %v653_v53 = vsel %vm650_vm11, %v652_v36, %v648_v24  ;;  %v883_v33 = vmul.f32 %v1237_v18, %v882_v56  ;;  %v892_v30 = vor.u32 1.1754944e-38, %v891_v17  ;;  %vm901_vm15 = vweird.f32 %v1239_v9 }
 0x1e8   :  { %v654_v44 = vmul.f32 %v1663_v46, %v653_v53  ;;  %v897_v39 = vsub.f32 1.0, %v896_v10  ;;  %v1241_v54 = vpop.eup %1240  ;;  %vm890_vm0 = vcmp.eq.f32.partialorder %v889_v8, 8.507059e+37  ;;  %vm900_vm2 = vweird.f32 %v2092_v37  ;;  %v2152_v37 = vpop.xlane.xlu0 %548 }
 0x1e9   :  { %v884_v22 = vadd.f32 %v1237_v18, %v883_v33  ;;  %v776_v2 = vmul.f32 %v1241_v54, %v2110_v14  ;;  %vm905_vm3 = vcmp.eq.f32.partialorder %v904_v25, 8.507059e+37  ;;  %v907_v6 = vor.u32 1.1754944e-38, %v906_v1  ;;  %vm902_vm4 = vmor %vm900_vm2, %vm901_vm15 }
 0x1ea   :  { %1036 = vst.msk [vmem:[%s2208_s2 + $0x30] sm:$0xff] %vm261_vm1, %v654_v44  ;;  %v898_v49 = vmul.f32 %v1239_v9, %v897_v39  ;;  %v1243_v51 = vpop.eup %1242  ;;  %vm780_vm5 = vweird.f32 %v2110_v14  ;;  %v784_v15 = vand.u32 2147483647, %v2110_v14  ;;  %v786_v47 = vand.u32 2147483648, %v2110_v14 }
 0x1eb   :  { %v888_v46 = vsel %vm887_vm14, %v1237_v18, %v884_v22  ;;  %v777_v29 = vsub.f32 1.0, %v776_v2  ;;  %v656_v43 = vmul.f32 %v1243_v51, %v2114_v0  ;;  %1246 = vrcp.f32 %v2144_v7 }
 0x1ec   :  { %v893_v42 = vsel %vm890_vm0, %v892_v30, %v888_v46  ;;  %v899_v60 = vadd.f32 %v1239_v9, %v898_v49  ;;  %v1245_v58 = vpop.eup %1244  ;;  %vm781_vm6 = vweird.f32 %v1241_v54  ;;  %v664_v34 = vand.u32 2147483647, %v2114_v0 }
 0x1ed   :  { %v894_v50 = vmul.f32 %v1676_v59, %v893_v42  ;;  %v778_v63 = vmul.f32 %v1241_v54, %v777_v29  ;;  %v657_v4 = vsub.f32 1.0, %v656_v43  ;;  %v666_v26 = vand.u32 2147483648, %v2114_v0  ;;  %vm782_vm8 = vmor %vm780_vm5, %vm781_vm6 }
 0x1ee   :  { %v903_v61 = vsel %vm902_vm4, %v1239_v9, %v899_v60  ;;  %v986_v57 = vmul.f32 %v1245_v58, %v2130_v52  ;;  %vm661_vm7 = vweird.f32 %v1243_v51  ;;  %1248 = vrcp.f32 %v2152_v37 }
 0x1ef   :  { %1052 = vst.msk [vmem:[%s2208_s2 + $0xb0] sm:$0xff] %vm261_vm1, %v894_v50  ;;  %v908_v59 = vsel %vm905_vm3, %v907_v6, %v903_v61  ;;  %v779_v32 = vadd.f32 %v1241_v54, %v778_v63  ;;  %v658_v55 = vmul.f32 %v1243_v51, %v657_v4  ;;  %vm785_vm9 = vcmp.eq.f32.partialorder %v784_v15, 8.507059e+37 }
 0x1f0   :  { %v909_v3 = vmul.f32 %v1678_v40, %v908_v59  ;;  %v787_v40 = vor.u32 1.1754944e-38, %v786_v47  ;;  %vm660_vm10 = vweird.f32 %v2114_v0  ;;  %v987_v19 = vsub.f32 1.0, %v986_v57 }
 0x1f1   :  { %v783_v35 = vsel %vm782_vm8, %v1241_v54, %v779_v32  ;;  %v659_v41 = vadd.f32 %v1243_v51, %v658_v55  ;;  %v994_v31 = vand.u32 2147483647, %v2130_v52  ;;  %v996_v13 = vand.u32 2147483648, %v2130_v52  ;;  %v1247_v12 = vpop.eup %1246  ;;  %vm662_vm11 = vmor %vm660_vm10, %vm661_vm7 }
 0x1f2   :  { %1053 = vst.msk [vmem:[%s2208_s2 + $0xb8] sm:$0xff] %vm261_vm1, %v909_v3  ;;  %v788_v18 = vsel %vm785_vm9, %v787_v40, %v783_v35  ;;  %v667_v21 = vor.u32 1.1754944e-38, %v666_v26  ;;  %v988_v48 = vmul.f32 %v1245_v58, %v987_v19  ;;  %vm991_vm12 = vweird.f32 %v1245_v58 }
 0x1f3   :  { %v789_v14 = vmul.f32 %v1685_v16, %v788_v18  ;;  %v663_v20 = vsel %vm662_vm11, %v1243_v51, %v659_v41  ;;  %vm665_vm13 = vcmp.eq.f32.partialorder %v664_v34, 8.507059e+37  ;;  %v1001_v45 = vmul.f32 %v1247_v12, %v2144_v7 }
 0x1f4   :  { %v668_v28 = vsel %vm665_vm13, %v667_v21, %v663_v20  ;;  %v989_v0 = vadd.f32 %v1245_v58, %v988_v48  ;;  %vm990_vm14 = vweird.f32 %v2130_v52  ;;  %v1249_v11 = vpop.eup %1248  ;;  %v997_v9 = vor.u32 1.1754944e-38, %v996_v13 }
 0x1f5   :  { %1045 = vst.msk [vmem:[%s2208_s2 + $0x78] sm:$0xff] %vm261_vm1, %v789_v14  ;;  %v669_v27 = vmul.f32 %v1689_v23, %v668_v28  ;;  %vm992_vm15 = vmor %vm990_vm14, %vm991_vm12  ;;  %v1002_v36 = vsub.f32 1.0, %v1001_v45  ;;  %vm995_vm0 = vcmp.eq.f32.partialorder %v994_v31, 8.507059e+37  ;;  %v1011_v56 = vand.u32 2147483648, %v2144_v7 }
 0x1f6   :  { %v993_v16 = vsel %vm992_vm15, %v1245_v58, %v989_v0  ;;  %v1016_v24 = vmul.f32 %v1249_v11, %v2152_v37  ;;  %vm1006_vm2 = vweird.f32 %v1247_v12  ;;  %v1009_v52 = vand.u32 2147483647, %v2144_v7 }
 0x1f7   :  { %1037 = vst.msk [vmem:[%s2208_s2 + $0x38] sm:$0xff] %vm261_vm1, %v669_v27  ;;  %v998_v17 = vsel %vm995_vm0, %v997_v9, %v993_v16  ;;  %v1003_v10 = vmul.f32 %v1247_v12, %v1002_v36  ;;  %vm1005_vm3 = vweird.f32 %v2144_v7  ;;  %v1026_v8 = vand.u32 2147483648, %v2152_v37 }
 0x1f8   :  { %v999_v23 = vmul.f32 %v1691_v38, %v998_v17  ;;  %v1017_v53 = vsub.f32 1.0, %v1016_v24  ;;  %vm1007_vm4 = vmor %vm1005_vm3, %vm1006_vm2  ;;  %v1012_v44 = vor.u32 1.1754944e-38, %v1011_v56  ;;  %vm1021_vm5 = vweird.f32 %v1249_v11 }
 0x1f9   :  { %v1004_v33 = vadd.f32 %v1247_v12, %v1003_v10  ;;  %v1024_v25 = vand.u32 2147483647, %v2152_v37  ;;  %vm1010_vm6 = vcmp.eq.f32.partialorder %v1009_v52, 8.507059e+37  ;;  %vm1020_vm7 = vweird.f32 %v2152_v37 }
 0x1fa   :  { %1059 = vst.msk [vmem:[%s2208_s2 + $0xe8] sm:$0xff] %vm261_vm1, %v999_v23  ;;  %v1018_v39 = vmul.f32 %v1249_v11, %v1017_v53  ;;  %vm1022_vm8 = vmor %vm1020_vm7, %vm1021_vm5  ;;  %v1027_v30 = vor.u32 1.1754944e-38, %v1026_v8 }
 0x1fb   :  { %v1008_v1 = vsel %vm1007_vm4, %v1247_v12, %v1004_v33  ;;  %vm1025_vm9 = vcmp.eq.f32.partialorder %v1024_v25, 8.507059e+37 }
 0x1fc   :  { %v1013_v38 = vsel %vm1010_vm6, %v1012_v44, %v1008_v1  ;;  %v1019_v22 = vadd.f32 %v1249_v11, %v1018_v39 }
 0x1fd   :  { %v1014_v54 = vmul.f32 %v1693_v62, %v1013_v38 }
 0x1fe   :  { %v1023_v49 = vsel %vm1022_vm8, %v1249_v11, %v1019_v22 }
 0x1ff   :  { %1060 = vst.msk [vmem:[%s2208_s2 + $0xf0] sm:$0xff] %vm261_vm1, %v1014_v54  ;;  %v1028_v46 = vsel %vm1025_vm9, %v1027_v30, %v1023_v49 }
 0x200   :  { %v1029_v2 = vmul.f32 %v1701_v5, %v1028_v46 }
 0x202   :  { %1061 = vst.msk [vmem:[%s2208_s2 + $0xf8] sm:$0xff] %vm261_vm1, %v1029_v2 }

</bundles_post_ra>
